<compile_context>
chip_gen: v7x
topology: tpu7x:2x2x1
jax: 0.10.0
libtpu: 0.0.40
codegen_flags: <defaults>
</compile_context>

<pallas_src>
import math

import jax
import jax.numpy as jnp
from jax.experimental import pallas as pl
from jax.experimental.pallas import tpu as pltpu

# Deterministic stand-ins for config.ALPHA / config.BETA / config.GAMMA.
ALPHA = 0.1
BETA = 0.01
GAMMA = 0.001
_WEIGHTS = (1.0, ALPHA, BETA, GAMMA)

_LANES = 128
_SUBLANES = 8

_SMEM_SPEC = pl.BlockSpec(memory_space=pltpu.MemorySpace.SMEM)


def _round_up(x, m):
    return ((x + m - 1) // m) * m


# ---------------------------------------------------------------------------
# Path 1: all four losses are scalars -> SMEM-only kernel (no VMEM traffic).
# ---------------------------------------------------------------------------
def _scalar_kernel(mse_ref, perc_ref, adv_ref, det_ref, out_ref):
    out_ref[0] = (
        mse_ref[0]
        + ALPHA * perc_ref[0]
        + BETA * adv_ref[0]
        + GAMMA * det_ref[0]
    )


def _total_loss_scalars(mse, perc, adv, det):
    args = [jnp.asarray(x, jnp.float32).reshape((1,)) for x in (mse, perc, adv, det)]
    out = pl.pallas_call(
        _scalar_kernel,
        out_shape=jax.ShapeDtypeStruct((1,), jnp.float32),
        grid=(),
        in_specs=[_SMEM_SPEC] * 4,
        out_specs=_SMEM_SPEC,
    )(*args)
    return out[0]


# ---------------------------------------------------------------------------
# Path 2: at least one loss is tensor-shaped.
# ---------------------------------------------------------------------------
def _make_tensor_kernel(tensor_weights, has_scalar):
    """kernel(scalar_ref?, *tensor_refs, out_ref)."""

    def kernel(*refs):
        out_ref = refs[-1]
        if has_scalar:
            s_ref = refs[0]
            t_refs = refs[1:-1]
        else:
            s_ref = None
            t_refs = refs[:-1]
        acc = None
        for ref, w in zip(t_refs, tensor_weights):
            term = ref[...] if w == 1.0 else jnp.float32(w) * ref[...]
            acc = term if acc is None else acc + term
        if has_scalar:
            acc = acc + s_ref[0]
        out_ref[...] = acc

    return kernel


def _choose_block_rows(rows, cols, n_tensor):
    """Tile rows from a VMEM budget, keeping >= ~8 grid steps when possible."""
    budget = 40 << 20                       # fits under vmem_limit_bytes=48MiB on all gens
    n_buffers = 2 * (n_tensor + 1)          # double-buffered tensor inputs + output
    tile_bytes = min(4 << 20, budget // n_buffers)
    br = max(_SUBLANES, (tile_bytes // (cols * 4)) // _SUBLANES * _SUBLANES)
    # keep >= ~8 steps so "parallel" can shard across v7x's 2 TCs and the
    # double-buffered pipeline has iterations to overlap
    steps_cap = max(_SUBLANES, _round_up(-(-rows // 8), _SUBLANES))
    br = min(br, steps_cap)
    if rows <= br:
        return rows                         # single full-extent block (always legal)
    return br                               # multiple of 8; ragged last block is fine


def total_loss(mse_loss, perc_loss, adv_loss, det_loss):
    """total = mse + ALPHA*perc + BETA*adv + GAMMA*det (torch broadcasting)."""
    args = [jnp.asarray(x, jnp.float32)
            for x in (mse_loss, perc_loss, adv_loss, det_loss)]
    out_shape = jnp.broadcast_shapes(*(a.shape for a in args))
    n = math.prod(out_shape) if out_shape else 1

    if n == 0:  # empty broadcast result — nothing to compute
        return jnp.zeros(out_shape, jnp.float32)

    is_scalar = tuple(a.size == 1 for a in args)

    # -- all-scalar fast path (the actual use case of this module) ----------
    if all(is_scalar):
        total = _total_loss_scalars(*args)
        return jnp.broadcast_to(total, out_shape)

    # -- tensor path ---------------------------------------------------------
    # Combine scalar losses into one weighted scalar (plain JAX; XLA fuses it).
    scalar_terms = [jnp.float32(w) * a.reshape(())
                    for a, w, sc in zip(args, _WEIGHTS, is_scalar) if sc]
    has_scalar = bool(scalar_terms)
    scalar_combined = None
    if has_scalar:
        s = scalar_terms[0]
        for t in scalar_terms[1:]:
            s = s + t
        scalar_combined = s.reshape((1,))

    # Tensor losses: a full-size input is a free reshape; true broadcasting is
    # the only case that still materializes a copy.
    tensor_flat = []
    tensor_weights = []
    for a, w, sc in zip(args, _WEIGHTS, is_scalar):
        if sc:
            continue
        if a.size == n:
            flat = a.reshape((n,))
        else:
            # TODO(synk): express leading-axis broadcast via BlockSpec index_map
            # reuse instead of materializing a full-size copy in HBM.
            flat = jnp.broadcast_to(a, out_shape).reshape((n,))
        tensor_flat.append(flat)
        tensor_weights.append(w)
    n_tensor = len(tensor_flat)

    # Lane-dense (rows, cols) view via a free reshape when n % 128 == 0;
    # otherwise pad flat by < 128 elements (the only unavoidable-pad case).
    cols = None
    for c in (1024, 2048, 512, 256, 128):
        if n % c == 0:
            cols = c
            break
    pad = 0
    if cols is None:
        cols = _LANES
        pad = _round_up(n, cols) - n
        tensor_flat = [jnp.pad(f, (0, pad)) for f in tensor_flat]
    rows = (n + pad) // cols

    block_rows = _choose_block_rows(rows, cols, n_tensor)
    grid = (pl.cdiv(rows, block_rows),)     # ragged last block: OOB reads are
                                            # don't-care, OOB writes are dropped
    vmem_spec = pl.BlockSpec((block_rows, cols), lambda i: (i, 0))

    in_specs = []
    call_args = []
    if has_scalar:
        in_specs.append(_SMEM_SPEC)
        call_args.append(scalar_combined)
    for f in tensor_flat:
        in_specs.append(vmem_spec)
        call_args.append(f.reshape((rows, cols)))

    out2d = pl.pallas_call(
        _make_tensor_kernel(tuple(tensor_weights), has_scalar),
        out_shape=jax.ShapeDtypeStruct((rows, cols), jnp.float32),
        grid=grid,
        in_specs=in_specs,
        out_specs=vmem_spec,
        compiler_params=pltpu.CompilerParams(
            dimension_semantics=("parallel",),
            vmem_limit_bytes=48 << 20),
        cost_estimate=pl.CostEstimate(
            flops=(2 * n_tensor + (1 if has_scalar else 0)) * n,
            transcendentals=0,
            bytes_accessed=(n_tensor + 1) * n * 4),
    )(*call_args)

    flat_out = out2d.reshape((rows * cols,))
    if pad:
        flat_out = flat_out[:n]
    return flat_out.reshape(out_shape)


def _reference(mse_loss, perc_loss, adv_loss, det_loss):
    return mse_loss + ALPHA * perc_loss + BETA * adv_loss + GAMMA * det_loss


if __name__ == "__main__":
    key = jax.random.PRNGKey(0)
    k1, k2, k3, k4 = jax.random.split(key, 4)

    # Scalar aux losses shared across cases.
    perc_loss = jnp.mean(jnp.abs(jax.random.normal(k2, (2, 32))))
    adv_loss = jnp.mean(jax.random.uniform(k3, (2,)))
    det_loss = jnp.mean(jax.random.uniform(k4, (2,)))

    # Case 1: the real use case — four 0-D scalar losses (SMEM path).
    mse_loss = jnp.mean(jax.random.normal(k1, (2, 4, 16, 16)) ** 2)
    out_scalar = jax.block_until_ready(
        total_loss(mse_loss, perc_loss, adv_loss, det_loss))
    ref_scalar = _reference(mse_loss, perc_loss, adv_loss, det_loss)
    assert jnp.allclose(out_scalar, ref_scalar, rtol=1e-5, atol=1e-6), (
        out_scalar, ref_scalar)

    # Case 2: per-pixel MSE map + scalar aux losses (tensor path, free reshape,
    # no padding, single-step grid).
    mse_map = jax.random.normal(k1, (2, 4, 16, 16)) ** 2
    out_map = jax.block_until_ready(
        total_loss(mse_map, perc_loss, adv_loss, det_loss))
    ref_map = _reference(mse_map, perc_loss, adv_loss, det_loss)
    assert out_map.shape == ref_map.shape
    assert jnp.allclose(out_map, ref_map, rtol=1e-5, atol=1e-6)

    # Case 3: n % 1024 != 0 but n % 128 == 0 -> ragged multi-step grid, no pad.
    mse_map3 = jax.random.normal(k1, (2, 4, 36, 36)) ** 2
    out3 = jax.block_until_ready(
        total_loss(mse_map3, perc_loss, adv_loss, det_loss))
    ref3 = _reference(mse_map3, perc_loss, adv_loss, det_loss)
    assert out3.shape == ref3.shape
    assert jnp.allclose(out3, ref3, rtol=1e-5, atol=1e-6)

    # Case 4: n not a multiple of 128 -> minimal pad (+<128) and trailing slice.
    mse_map4 = jax.random.normal(k1, (2, 5, 7, 3)) ** 2
    out4 = jax.block_until_ready(
        total_loss(mse_map4, perc_loss, adv_loss, det_loss))
    ref4 = _reference(mse_map4, perc_loss, adv_loss, det_loss)
    assert out4.shape == ref4.shape
    assert jnp.allclose(out4, ref4, rtol=1e-5, atol=1e-6)

    print("KERNEL_OK")
</pallas_src>

<mosaic_0001>
module attributes {stable_mosaic.version = 11 : i64} {
  func.func @_scalar_kernel(%arg0: memref<1xf32, #tpu.memory_space<smem>>, %arg1: memref<1xf32, #tpu.memory_space<smem>>, %arg2: memref<1xf32, #tpu.memory_space<smem>>, %arg3: memref<1xf32, #tpu.memory_space<smem>>, %arg4: memref<1xf32, #tpu.memory_space<smem>>) attributes {dimension_semantics = [], scalar_prefetch = 0 : i64, scratch_operands = 0 : i64, tpu.core_type = #tpu.core_type<tc>} {
    %c0 = arith.constant 0 : index
    %0 = memref.load %arg0[%c0] : memref<1xf32, #tpu.memory_space<smem>>
    %c0_0 = arith.constant 0 : index
    %1 = memref.load %arg1[%c0_0] : memref<1xf32, #tpu.memory_space<smem>>
    %cst = arith.constant 1.000000e-01 : f32
    %2 = arith.mulf %cst, %1 : f32
    %3 = arith.addf %0, %2 : f32
    %c0_1 = arith.constant 0 : index
    %4 = memref.load %arg2[%c0_1] : memref<1xf32, #tpu.memory_space<smem>>
    %cst_2 = arith.constant 0.00999999977 : f32
    %5 = arith.mulf %cst_2, %4 : f32
    %6 = arith.addf %3, %5 : f32
    %c0_3 = arith.constant 0 : index
    %7 = memref.load %arg3[%c0_3] : memref<1xf32, #tpu.memory_space<smem>>
    %cst_4 = arith.constant 1.000000e-03 : f32
    %8 = arith.mulf %cst_4, %7 : f32
    %9 = arith.addf %6, %8 : f32
    %c0_5 = arith.constant 0 : index
    %10 = memref.load %arg4[%c0_5] : memref<1xf32, #tpu.memory_space<smem>>
    memref.store %9, %arg4[%c0_5] : memref<1xf32, #tpu.memory_space<smem>>
    return
  }
}

</mosaic_0001>

<bundles_post_ra>
// kernel: tpu_custom_call.1
= control target key start
LH: loop header
LB: loop body
LE: loop exit
PB: predicated region body
PF: predicated region fallthrough
CT: control target
= control target key end

     0   :  { %13 = vsyncpa [#allocation7], 0  ;;  %s110_s0 = inlined_call_operand.<no memory space> [shape: f32[1], index: 0, kind: input, shape index: {}]   ;;  %s111_s1 = inlined_call_operand.<no memory space> [shape: f32[1], index: 1, kind: input, shape index: {}]   ;;  %s112_s2 = inlined_call_operand.<no memory space> [shape: f32[1], index: 2, kind: input, shape index: {}]   ;;  %s113_s3 = inlined_call_operand.<no memory space> [shape: f32[1], index: 3, kind: input, shape index: {}]   ;;  %s114_s4 = inlined_call_operand.hbm [shape: f32[1], index: 4, kind: output, shape index: {}]  }
   0x1   :  { %s24_s17 = smul.f32 0.1, %s111_s1  ;;  %s48_s5 = scalar_lea.hbm %s114_s4, 16 }
   0x2   :  { %s27_s20 = smul.f32 0.01, %s112_s2  ;;  %p49_p0 = scmp.ne.s32.totalorder %s114_s4, %s48_s5 }
   0x3   :  { %s25_s23 = sadd.f32 %s24_s17, %s110_s0  ;;  %s30_s26 = smul.f32 0.001, %s113_s3 }
   0x4   :  { %p52_p1 = scmp.lt.u32.totalorder %s48_s5, %s114_s4 }
   0x5   :  { %s28_s27 = sadd.f32 %s27_s20, %s25_s23 }
   0x6   :  { %p54_p2 = pnand %p52_p1, %p49_p0 }
   0x7   :  { %s31_s28 = sadd.f32 %s30_s26, %s28_s27 }
   0x9   :  { %33 = sst [smem:[#allocation6]] %s31_s28 }
   0xa   :  { %57 = shalt.err (!%p54_p2)
}
   0xb   :  { %s60_s0 = smov [#allocation6]  }
   0xc   :  { %41 = dma.smem_to_hbm %s60_s0, 16, %s114_s4, [#allocation7]  }
   0xd   :  { %58 = dma.done.wait [#allocation7], 16  }
   0xe   :  { %59 = vsyncadd [#allocation7], 4294967280 }
   0xf   :  { %45 = sfence }
  0x10   :  { %46 = vsyncpa [#allocation7], 1 }

</bundles_post_ra>
